<compile_context>
chip_gen: v7x
topology: tpu7x:2x2x1
jax: 0.10.0
libtpu: 0.0.40
codegen_flags: <defaults>
</compile_context>

<pallas_src>
import functools

import jax
import jax.numpy as jnp
from jax import lax
from jax.experimental import pallas as pl
from jax.experimental.pallas import tpu as pltpu


def _round_up(n, m):
    return (n + m - 1) // m * m


def _mlp_kernel(num_layers, hidden_activation, *refs):
    """refs = (x_ref, w1, b1, ..., wL, bL, out_ref).

    x_ref:   (tile_b, in_dim)   native layout, batch on sublanes for the load
    w_i:     (out_i, in_i)      torch layout, VMEM-resident across grid steps
    b_i:     (out_i, 1)         float32
    out_ref: (out_dim, tile_b)  batch on lanes -> lane-dense store
    """
    x_ref = refs[0]
    out_ref = refs[-1]
    params = refs[1:-1]

    def hidden_act(z):
        if hidden_activation == "sigmoid":
            # Exact identity sigmoid(z) = 0.5*(tanh(z/2)+1): one EUP op, no divide.
            return 0.5 * (jnp.tanh(0.5 * z) + 1.0)
        if hidden_activation == "tanh":
            return jnp.tanh(z)
        if hidden_activation == "softsign":
            d = 1.0 + jnp.abs(z)
            r = pl.reciprocal(d, approx=True)
            r = r * (2.0 - d * r)          # one Newton step -> ~f32 accurate
            return z * r
        raise ValueError(f"No such function name '{hidden_activation}'")

    h = None
    for layer in range(num_layers):
        w = params[2 * layer][...]         # loaded once per grid step (tiny)
        b = params[2 * layer + 1][...]     # (out_i, 1), broadcasts over lanes
        if layer == 0:
            # Contract the in_dim axis of both operands so the result is
            # (out_0, tile_b) with batch on lanes - no transpose of x needed.
            z = lax.dot_general(
                w, x_ref[...], (((1,), (1,)), ((), ())),
                preferred_element_type=jnp.float32)
        else:
            z = jnp.dot(w, h.astype(w.dtype), preferred_element_type=jnp.float32)
        z = z + b
        if layer == num_layers - 1:
            # funlist: final layer is always Softsign; exact divide on one row.
            h = z / (1.0 + jnp.abs(z))
        else:
            h = hidden_act(z)
    out_ref[...] = h.astype(out_ref.dtype)


def regression_mlp_forward(x, weights, biases, hidden_activation="sigmoid",
                           tile_b=4096, min_grid=2):
    """Fused MLP forward.

    x:       (batch, input_size) float32 (or bfloat16 from the producer)
    weights: list of torch-layout (out_i, in_i)
    biases:  list of (out_i,)
    returns: (batch, 1) float32
    """
    num_layers = len(weights)
    batch, in_dim = x.shape
    out_dim = weights[-1].shape[0]
    compute_dtype = x.dtype

    # Lane-dense batch tile: as large as practical (per-grid-step overhead
    # dominates for this tiny net) but capped so grid >= min_grid steps so the
    # "parallel" axis can shard across v7x's 2 TensorCores.
    tile_b = _round_up(max(128, tile_b), 128)
    if batch > 128 * min_grid:
        cap = _round_up(pl.cdiv(batch, min_grid), 128)
    else:
        cap = _round_up(batch, 128)
    tile_b = max(128, min(tile_b, cap))
    grid = (pl.cdiv(batch, tile_b),)   # ragged last block handled by Pallas

    flat_params, param_specs = [], []
    for w, b in zip(weights, biases):
        w = jnp.asarray(w, compute_dtype)
        b = jnp.asarray(b, jnp.float32).reshape(-1, 1)
        flat_params += [w, b]
        # Full-array blocks + constant index_map -> fetched once, kept
        # VMEM-resident for every grid step (pipeline skips re-copies when the
        # block index does not change).
        param_specs += [pl.BlockSpec(w.shape, lambda i: (0, 0)),
                        pl.BlockSpec(b.shape, lambda i: (0, 0))]

    kernel = functools.partial(_mlp_kernel, num_layers, hidden_activation)

    out_t = pl.pallas_call(
        kernel,
        out_shape=jax.ShapeDtypeStruct((out_dim, batch), jnp.float32),
        grid=grid,
        in_specs=[pl.BlockSpec((tile_b, in_dim), lambda i: (i, 0))] + param_specs,
        out_specs=pl.BlockSpec((out_dim, tile_b), lambda i: (0, i)),
        compiler_params=pltpu.CompilerParams(
            dimension_semantics=("parallel",)),
    )(x, *flat_params)

    return out_t.T  # (batch, out_dim); out_dim == 1, so this transpose is tiny


def reference_forward(x, weights, biases, hidden_activation="sigmoid"):
    """Pure-JAX reference of the torch forward (f32-accurate matmuls)."""
    act = {"sigmoid": lambda z: 1.0 / (1.0 + jnp.exp(-z)),
           "tanh": jnp.tanh,
           "softsign": lambda z: z / (1.0 + jnp.abs(z))}[hidden_activation]
    h = x
    for i, (w, b) in enumerate(zip(weights, biases)):
        z = jnp.dot(h, w.T, precision="highest") + b
        h = z / (1.0 + jnp.abs(z)) if i == len(weights) - 1 else act(z)
    return h


def _torch_like_linear_init(key, in_features, out_features):
    """Mirror torch.nn.Linear default init (uniform +-1/sqrt(in)), torch layout."""
    kw, kb = jax.random.split(key)
    bound = 1.0 / jnp.sqrt(jnp.float32(in_features))
    w = jax.random.uniform(kw, (out_features, in_features), jnp.float32, -bound, bound)
    b = jax.random.uniform(kb, (out_features,), jnp.float32, -bound, bound)
    return w, b


if __name__ == "__main__":
    # Module config: hiddenLayers=2, hiddenNodes=[32, 16], inputSize=32
    # => layer sizes [32, 32, 16, 1]; sigmoid on hidden layers, softsign on output.
    hidden_layers = 2
    hidden_nodes = [32, 16]
    input_size = 32
    batch = 300          # deliberately NOT a multiple of 128: exercises the
                         # ragged last grid block (pad-read x, masked lane store)
    tile_b = 128         # small demo tile -> grid=(3,)

    sizes = [input_size] + hidden_nodes + [1]

    key = jax.random.PRNGKey(0)
    key, xk = jax.random.split(key)
    x = jax.random.normal(xk, (batch, input_size), jnp.float32)

    weights, biases = [], []
    for fin, fout in zip(sizes[:-1], sizes[1:]):
        key, lk = jax.random.split(key)
        w, b = _torch_like_linear_init(lk, fin, fout)
        weights.append(w)
        biases.append(b)

    out = regression_mlp_forward(x, weights, biases,
                                 hidden_activation="sigmoid", tile_b=tile_b)
    out = jax.block_until_ready(out)

    ref = reference_forward(x, weights, biases, hidden_activation="sigmoid")
    assert out.shape == (batch, 1)
    # Kernel elementwise math is now exact (no approx reciprocal); the remaining
    # tolerance only covers the MXU's default f32-matmul precision vs the
    # precision="highest" reference dot.
    assert jnp.allclose(out, ref, atol=2e-3, rtol=2e-3), "mismatch vs reference"

    print("KERNEL_OK")
</pallas_src>

<mosaic_0001>
module attributes {stable_mosaic.version = 11 : i64} {
  func.func @_mlp_kernel(%arg0: i32, %arg1: memref<128x32xf32, #tpu.memory_space<vmem>>, %arg2: memref<32x32xf32, #tpu.memory_space<vmem>>, %arg3: memref<32x1xf32, #tpu.memory_space<vmem>>, %arg4: memref<16x32xf32, #tpu.memory_space<vmem>>, %arg5: memref<16x1xf32, #tpu.memory_space<vmem>>, %arg6: memref<1x16xf32, #tpu.memory_space<vmem>>, %arg7: memref<1x1xf32, #tpu.memory_space<vmem>>, %arg8: memref<1x128xf32, #tpu.memory_space<vmem>>) attributes {dimension_semantics = [#tpu.dimension_semantics<parallel>], iteration_bounds = array<i64: 3>, scalar_prefetch = 0 : i64, scratch_operands = 0 : i64, tpu.core_type = #tpu.core_type<tc>, window_params = [{transform_indices = @transform_0, window_bounds = array<i64: 128, 32>}, {pipeline_mode = #tpu.pipeline_mode<synchronous>, transform_indices = @transform_1, window_bounds = array<i64: 32, 32>}, {pipeline_mode = #tpu.pipeline_mode<synchronous>, transform_indices = @transform_2, window_bounds = array<i64: 32, 1>}, {pipeline_mode = #tpu.pipeline_mode<synchronous>, transform_indices = @transform_3, window_bounds = array<i64: 16, 32>}, {pipeline_mode = #tpu.pipeline_mode<synchronous>, transform_indices = @transform_4, window_bounds = array<i64: 16, 1>}, {pipeline_mode = #tpu.pipeline_mode<synchronous>, transform_indices = @transform_5, window_bounds = array<i64: 1, 16>}, {pipeline_mode = #tpu.pipeline_mode<synchronous>, transform_indices = @transform_6, window_bounds = array<i64: 1, 1>}, {transform_indices = @transform_7, window_bounds = array<i64: 1, 128>}]} {
    %c0 = arith.constant 0 : index
    %c0_0 = arith.constant 0 : index
    %0 = vector.load %arg2[%c0, %c0_0] : memref<32x32xf32, #tpu.memory_space<vmem>>, vector<32x32xf32>
    %c0_1 = arith.constant 0 : index
    %c0_2 = arith.constant 0 : index
    %1 = vector.load %arg3[%c0_1, %c0_2] : memref<32x1xf32, #tpu.memory_space<vmem>>, vector<32x1xf32>
    %c0_3 = arith.constant 0 : index
    %c0_4 = arith.constant 0 : index
    %2 = vector.load %arg1[%c0_3, %c0_4] : memref<128x32xf32, #tpu.memory_space<vmem>>, vector<128x32xf32>
    %cst = arith.constant dense<0.000000e+00> : vector<32x128xf32>
    %3 = tpu.matmul %0, %2, %cst {dimension_numbers = #tpu.dot_dimension_numbers<[1], [1], [0], [0], [0, 0, 1, 0], [], []>} : vector<32x32xf32>, vector<128x32xf32>, vector<32x128xf32> -> vector<32x128xf32>
    %4 = vector.broadcast %1 : vector<32x1xf32> to vector<32x128xf32>
    %5 = arith.addf %3, %4 : vector<32x128xf32>
    %cst_5 = arith.constant 5.000000e-01 : f32
    %6 = vector.broadcast %cst_5 : f32 to vector<32x128xf32>
    %7 = arith.mulf %6, %5 : vector<32x128xf32>
    %8 = math.tanh %7 : vector<32x128xf32>
    %cst_6 = arith.constant 1.000000e+00 : f32
    %9 = vector.broadcast %cst_6 : f32 to vector<32x128xf32>
    %10 = arith.addf %8, %9 : vector<32x128xf32>
    %cst_7 = arith.constant 5.000000e-01 : f32
    %11 = vector.broadcast %cst_7 : f32 to vector<32x128xf32>
    %12 = arith.mulf %11, %10 : vector<32x128xf32>
    %c0_8 = arith.constant 0 : index
    %c0_9 = arith.constant 0 : index
    %13 = vector.load %arg4[%c0_8, %c0_9] : memref<16x32xf32, #tpu.memory_space<vmem>>, vector<16x32xf32>
    %c0_10 = arith.constant 0 : index
    %c0_11 = arith.constant 0 : index
    %14 = vector.load %arg5[%c0_10, %c0_11] : memref<16x1xf32, #tpu.memory_space<vmem>>, vector<16x1xf32>
    %cst_12 = arith.constant dense<0.000000e+00> : vector<16x128xf32>
    %15 = tpu.matmul %13, %12, %cst_12 {dimension_numbers = #tpu.dot_dimension_numbers<[1], [0], [0], [1], [0, 0, 1, 1], [], []>} : vector<16x32xf32>, vector<32x128xf32>, vector<16x128xf32> -> vector<16x128xf32>
    %16 = vector.broadcast %14 : vector<16x1xf32> to vector<16x128xf32>
    %17 = arith.addf %15, %16 : vector<16x128xf32>
    %cst_13 = arith.constant 5.000000e-01 : f32
    %18 = vector.broadcast %cst_13 : f32 to vector<16x128xf32>
    %19 = arith.mulf %18, %17 : vector<16x128xf32>
    %20 = math.tanh %19 : vector<16x128xf32>
    %cst_14 = arith.constant 1.000000e+00 : f32
    %21 = vector.broadcast %cst_14 : f32 to vector<16x128xf32>
    %22 = arith.addf %20, %21 : vector<16x128xf32>
    %cst_15 = arith.constant 5.000000e-01 : f32
    %23 = vector.broadcast %cst_15 : f32 to vector<16x128xf32>
    %24 = arith.mulf %23, %22 : vector<16x128xf32>
    %c0_16 = arith.constant 0 : index
    %c0_17 = arith.constant 0 : index
    %25 = vector.load %arg6[%c0_16, %c0_17] : memref<1x16xf32, #tpu.memory_space<vmem>>, vector<1x16xf32>
    %c0_18 = arith.constant 0 : index
    %c0_19 = arith.constant 0 : index
    %26 = vector.load %arg7[%c0_18, %c0_19] : memref<1x1xf32, #tpu.memory_space<vmem>>, vector<1x1xf32>
    %cst_20 = arith.constant dense<0.000000e+00> : vector<1x128xf32>
    %27 = tpu.matmul %25, %24, %cst_20 {dimension_numbers = #tpu.dot_dimension_numbers<[1], [0], [0], [1], [0, 0, 1, 1], [], []>} : vector<1x16xf32>, vector<16x128xf32>, vector<1x128xf32> -> vector<1x128xf32>
    %28 = vector.broadcast %26 : vector<1x1xf32> to vector<1x128xf32>
    %29 = arith.addf %27, %28 : vector<1x128xf32>
    %30 = math.absf %29 : vector<1x128xf32>
    %cst_21 = arith.constant 1.000000e+00 : f32
    %31 = vector.broadcast %cst_21 : f32 to vector<1x128xf32>
    %32 = arith.addf %31, %30 : vector<1x128xf32>
    %33 = arith.divf %29, %32 : vector<1x128xf32>
    %c0_22 = arith.constant 0 : index
    %c0_23 = arith.constant 0 : index
    %34 = vector.load %arg8[%c0_22, %c0_23] : memref<1x128xf32, #tpu.memory_space<vmem>>, vector<1x128xf32>
    tpu.vector_store %arg8[%c0_22, %c0_23], %33 {strides = array<i32>} : memref<1x128xf32, #tpu.memory_space<vmem>>, vector<1x128xf32>,
    return
  }
  func.func @transform_0(%arg0: i32) -> (i32, i32) {
    %c0_i32 = arith.constant 0 : i32
    %c0_i32_0 = arith.constant 0 : i32
    return %arg0, %c0_i32 : i32, i32
  }
  func.func @transform_1(%arg0: i32) -> (i32, i32) {
    %c0_i32 = arith.constant 0 : i32
    %c0_i32_0 = arith.constant 0 : i32
    %c0_i32_1 = arith.constant 0 : i32
    return %c0_i32, %c0_i32_0 : i32, i32
  }
  func.func @transform_2(%arg0: i32) -> (i32, i32) {
    %c0_i32 = arith.constant 0 : i32
    %c0_i32_0 = arith.constant 0 : i32
    %c0_i32_1 = arith.constant 0 : i32
    return %c0_i32, %c0_i32_0 : i32, i32
  }
  func.func @transform_3(%arg0: i32) -> (i32, i32) {
    %c0_i32 = arith.constant 0 : i32
    %c0_i32_0 = arith.constant 0 : i32
    %c0_i32_1 = arith.constant 0 : i32
    return %c0_i32, %c0_i32_0 : i32, i32
  }
  func.func @transform_4(%arg0: i32) -> (i32, i32) {
    %c0_i32 = arith.constant 0 : i32
    %c0_i32_0 = arith.constant 0 : i32
    %c0_i32_1 = arith.constant 0 : i32
    return %c0_i32, %c0_i32_0 : i32, i32
  }
  func.func @transform_5(%arg0: i32) -> (i32, i32) {
    %c0_i32 = arith.constant 0 : i32
    %c0_i32_0 = arith.constant 0 : i32
    %c0_i32_1 = arith.constant 0 : i32
    return %c0_i32, %c0_i32_0 : i32, i32
  }
  func.func @transform_6(%arg0: i32) -> (i32, i32) {
    %c0_i32 = arith.constant 0 : i32
    %c0_i32_0 = arith.constant 0 : i32
    %c0_i32_1 = arith.constant 0 : i32
    return %c0_i32, %c0_i32_0 : i32, i32
  }
  func.func @transform_7(%arg0: i32) -> (i32, i32) {
    %c0_i32 = arith.constant 0 : i32
    %c0_i32_0 = arith.constant 0 : i32
    return %c0_i32, %arg0 : i32, i32
  }
}

</mosaic_0001>

<bundles_post_ra>
// kernel: tpu_custom_call.1
= control target key start
LH: loop header
LB: loop body
LE: loop exit
PB: predicated region body
PF: predicated region fallthrough
CT: control target
= control target key end

     0   :  { %s1314_s0 = inlined_call_operand.vmem [shape: f32[300,32], index: 0, kind: input, shape index: {}]   ;;  %s1315_s1 = inlined_call_operand.vmem [shape: f32[32,32], index: 1, kind: input, shape index: {}]   ;;  %s1316_s2 = inlined_call_operand.vmem [shape: f32[32,1], index: 2, kind: input, shape index: {}]   ;;  %s1317_s3 = inlined_call_operand.vmem [shape: f32[16,32], index: 3, kind: input, shape index: {}]   ;;  %s1318_s4 = inlined_call_operand.vmem [shape: f32[16,1], index: 4, kind: input, shape index: {}]   ;;  %s1319_s5 = inlined_call_operand.vmem [shape: f32[1,16], index: 5, kind: input, shape index: {}]   ;;  %s1320_s6 = inlined_call_operand.<no memory space> [shape: f32[1,1], index: 6, kind: input, shape index: {}]   ;;  %s1321_s7 = inlined_call_operand.hbm [shape: f32[1,300], index: 7, kind: output, shape index: {}]  }
   0x1   :  { %v12_v0 = vstv %s1320_s6 }
   0x2   :  { %13 = vst [vmem:[#allocation2] sm:$0x1] %v12_v0 }
   0x3   :  { %14 = vsyncpa [#allocation4], 0 }
   0x4   :  { %16 = vsyncpa [#allocation4 + $0x1], 0  ;;  %s1114_s26 = smov 0   ;;  %s1116_s27 = smov 0  }
   0x5   :  { %s1118_s28 = smov 0   ;;  %s1120_s29 = smov 0  }
   0x6 LB: > { %s766_s6 = sadd.s32 4294967295, %s1064_s29   ;;  %s767_s30 = sadd.s32 4294967294, %s1064_s29   ;;  %s1064_s29 = sphi %s1120_s29, %s1329_s29   ;;  %s1060_s28 = sphi %s1118_s28, %s1328_s28   ;;  %s1056_s27 = sphi %s1116_s27, %s1327_s27   ;;  %s1052_s26 = sphi %s1114_s26, %s1326_s26  }
   0x7   : > { %s1137_s8 = sadd.s32 1, %s1064_s29   ;;  %s181_s9 = sadd.s32 1, %s1060_s28 }
   0x8   : > { %s178_s10 = ssub.s32 %s1064_s29, %s1137_s8  ;;  %p191_p0 = scmp.ne.s32.totalorder %s1060_s28, %s1056_s27 }
   0x9   : > { %p179_p1 = scmp.eq.s32.totalorder %s178_s10, 0  ;;  %p192_p2 = scmp.eq.s32.totalorder %s766_s6, 2 }
   0xa   : > { %p197_p3 = scmp.ne.s32.totalorder %s1056_s27, %s1052_s26  ;;  %p198_p4 = scmp.eq.s32.totalorder %s767_s30, 2 }
   0xb   : > { %s1147_s11 = scalar_select %p179_p1, %s1060_s28, %s181_s9  }
   0xc   : > { %p1149_p5 = por %p192_p2, %p191_p0  ;;  %p1153_p6 = por %p198_p4, %p197_p3 }
   0xd   : > { %p770_p7 = scmp.ge.s32.totalorder %s1064_s29, 1  ;;  %p251_p8 = scmp.lt.s32.totalorder %s1064_s29, 4 }
   0xf   : > { %p252_p9 = pnand %p770_p7, %p251_p8 }
  0x10   : > { %s1159_s14 = sshll.u32 (!%p252_p9), %s766_s6, 4  ;;  %vm344_vm0 = vcmask (!%p252_p9), 261120   ;;  %v300_v1 = vld [vmem:[%s1315_s1] sm:$0xff] (!%p252_p9)  ;;  %v1066_v2 = vmov (!%p252_p9), 0   ;;  %v306_v4 = vld [vmem:[%s1316_s2 + $0x10] sm:$0xff] (!%p252_p9)  ;;  %v305_v5 = vld [vmem:[%s1316_s2 + $0x8] sm:$0xff] (!%p252_p9) }
  0x11   : > { %255 = sbr.rel (%p252_p9) target bundleno = 819 (0x333), region = 48  ;;  %p291_p10 = scmp.lt.s32.totalorder (!%p252_p9), %s1159_s14, 37  ;;  %860 = vmatprep.mubr.msk.f32.mxu0 (!%p252_p9), %vm344_vm0, %v300_v1  ;;  %986 = vset.pattern.permute.xlu0 (!%p252_p9), %v1066_v2  ;;  %v304_v3 = vld [vmem:[%s1316_s2] sm:$0xff] (!%p252_p9)  ;;  %v307_v6 = vld [vmem:[%s1316_s2 + $0x18] sm:$0xff] (!%p252_p9)  ;;  %vm1186_vm1 = vmpackc.low (!%p252_p9), %vm344_vm0, %vm344_vm0  ;;  %vm1068_vm2 = vmmov (!%p252_p9), 0   ;;  %v1069_v7 = vmov (!%p252_p9), 0.0  }
  0x12   : > { %326 = vperm.xlu0 (!%p252_p9), %986, %v304_v3   ;;  %987 = vset.pattern.permute.xlu1 (!%p252_p9), %v1066_v2  ;;  %v508_v8 = vld [vmem:[%s1318_s4] sm:$0xff] (!%p252_p9)  ;;  %v509_v14 = vld [vmem:[%s1318_s4 + $0x8] sm:$0xff] (!%p252_p9)  ;;  %v302_v36 = vld [vmem:[%s1315_s1 + $0x10] sm:$0xff] (!%p252_p9)  ;;  %vm620_vm3 = vcmask (!%p252_p9), 130048   ;;  %s284_s16 = sand.u32 (!%p252_p9), 1, %s1056_s27   ;;  %s1070_s24 = smov (!%p252_p9), [#allocation3]  }
  0x13   : > { %336 = vperm.xlu1 (!%p252_p9), %987, %v306_v4   ;;  %v610_v16 = vld [vmem:[#allocation2] sm:$0x1] (!%p252_p9)  ;;  %v301_v35 = vld [vmem:[%s1315_s1 + $0x8] sm:$0xff] (!%p252_p9)  ;;  %v303_v37 = vld [vmem:[%s1315_s1 + $0x18] sm:$0xff] (!%p252_p9)  ;;  %s285_s17 = scalar_lea.vmem (!%p252_p9), [#allocation3], %s284_s16  ;;  %s700_s22 = scalar_lea.sflag (!%p252_p9), [#allocation4], %s284_s16 }
  0x14   : > { %v506_v38 = vld [vmem:[%s1317_s3] sm:$0xff] (!%p252_p9)  ;;  %s712_s18 = sshll.u32 (!%p252_p9), %s285_s17, 4  ;;  %s1006_s25 = sshll.u32 (!%p252_p9), %s1070_s24, 4  ;;  %s1274_s18 = int_to_ptr.vmem [resolvable:$true] %s712_s18  ;;  %s1007_s25 = int_to_ptr.vmem [resolvable:$false] %s1006_s25 }
  0x15   : > { %874 = vmatprep.mubr.msk.f32.mxu1 (!%p252_p9), %vm344_vm0, %v506_v38  ;;  %s1002_s23 = scalar_lea.vmem (!%p252_p9), %s1274_s18, 16  ;;  %p1009_p0 = scmp.lt.s32.totalorder (!%p252_p9), %s1274_s18, %s1007_s25 }
  0x16   : > { %331 = vperm.xlu0 (!%p252_p9), %986, %v305_v5   ;;  %v507_v5 = vld [vmem:[%s1317_s3 + $0x8] sm:$0xff] (!%p252_p9)  ;;  %p1003_p11 = scmp.ne.s32.totalorder (!%p252_p9), %s1274_s18, %s1002_s23 }
  0x17   : > { %341 = vperm.xlu1 (!%p252_p9), %987, %v307_v6   ;;  %v1067_v6 = vmov (!%p252_p9), 0.0|0.0  }
  0x18   : > { %s292_s21 = scalar_select %p291_p10, %s1159_s14, 37 }
  0x19   : > { %p1004_p12 = pnand %p1003_p11, %p1149_p5 }
  0x1a   : > { %s772_s6 = sshll.u32 %s292_s21, 3  ;;  %512 = vperm.xlu0 %986, %v508_v8   ;;  %s1272_s21 = scalar_lea.hbm %s1321_s7, %s1159_s14 }
  0x1b   : > { %s1182_s10 = scalar_lea.vmem %s1314_s0, %s772_s6  ;;  %517 = vperm.xlu1 %987, %v509_v14   ;;  %p1005_p13 = pneg %p1004_p12 }
  0x1c   : > { %v308_v9 = vld [vmem:[%s1182_s10] sm:$0xff]  ;;  %v309_v10 = vld [vmem:[%s1182_s10 + $0x8] sm:$0xff]  ;;  %v310_v11 = vld [vmem:[%s1182_s10 + $0x10] sm:$0xff]  ;;  %s1008_s6 = scalar_lea.vmem %s1007_s25, 32 }
  0x1d   : > { %v884_v12 = vpack.c.bf16 %v309_v10, %v308_v9  ;;  %v311_v13 = vld [vmem:[%s1182_s10 + $0x18] sm:$0xff]  ;;  %v312_v17 = vld [vmem:[%s1182_s10 + $0x20] sm:$0xff]  ;;  %v313_v18 = vld [vmem:[%s1182_s10 + $0x28] sm:$0xff]  ;;  %p1010_p1 = scmp.lt.s32.totalorder %s1008_s6, %s1002_s23 }
  0x1e   : > { %v890_v15 = vpack.c.bf16 %v311_v13, %v310_v11  ;;  %613 = vperm.xlu0 %986, %v610_v16   ;;  %v896_v19 = vpack.c.bf16 %v313_v18, %v312_v17  ;;  %v314_v20 = vld [vmem:[%s1182_s10 + $0x30] sm:$0xff]  ;;  %v315_v21 = vld [vmem:[%s1182_s10 + $0x38] sm:$0xff]  ;;  %v316_v23 = vld [vmem:[%s1182_s10 + $0x40] sm:$0xff] }
  0x1f   : > { %886 = vmatprep.subr.msk.bf16.mxu0 %vm1186_vm1, %v884_v12  ;;  %v902_v22 = vpack.c.bf16 %v315_v21, %v314_v20  ;;  %v317_v24 = vld [vmem:[%s1182_s10 + $0x48] sm:$0xff]  ;;  %v318_v26 = vld [vmem:[%s1182_s10 + $0x50] sm:$0xff]  ;;  %v319_v27 = vld [vmem:[%s1182_s10 + $0x58] sm:$0xff]  ;;  %p1011_p2 = por %p1010_p1, %p1009_p0 }
  0x20   : > { %889 = vmatpush3.bf16.xpose.msk.msra.mxu0 %vm1186_vm1, %v884_v12  ;;  %v908_v25 = vpack.c.bf16 %v317_v24, %v316_v23  ;;  %v914_v28 = vpack.c.bf16 %v319_v27, %v318_v26  ;;  %v320_v29 = vld [vmem:[%s1182_s10 + $0x60] sm:$0xff]  ;;  %v321_v30 = vld [vmem:[%s1182_s10 + $0x68] sm:$0xff]  ;;  %v322_v32 = vld [vmem:[%s1182_s10 + $0x70] sm:$0xff]  ;;  %v616_v24 = vlaneseq }
  0x21   : > { %892 = vmatprep.subr.msk.bf16.mxu0 %vm1186_vm1, %v890_v15  ;;  %v920_v31 = vpack.c.bf16 %v321_v30, %v320_v29  ;;  %v323_v33 = vld [vmem:[%s1182_s10 + $0x78] sm:$0xff]  ;;  %v609_v23 = vld [vmem:[%s1319_s5] sm:$0x1]  ;;  %p1012_p3 = pnand %p1011_p2, %p1005_p13 }
  0x22   : > { %v926_v34 = vpack.c.bf16 %v323_v33, %v322_v32 }
  0x28   : > { %895 = vmatpush3.bf16.xpose.msk.msra.mxu0 %vm1186_vm1, %v890_v15 }
  0x29   : > { %898 = vmatprep.subr.msk.bf16.mxu0 %vm1186_vm1, %v896_v19 }
  0x30   : > { %901 = vmatpush3.bf16.xpose.msk.msra.mxu0 %vm1186_vm1, %v896_v19 }
  0x31   : > { %904 = vmatprep.subr.msk.bf16.mxu0 %vm1186_vm1, %v902_v22 }
  0x38   : > { %907 = vmatpush3.bf16.xpose.msk.msra.mxu0 %vm1186_vm1, %v902_v22 }
  0x39   : > { %910 = vmatprep.subr.msk.bf16.mxu0 %vm1186_vm1, %v908_v25 }
  0x40   : > { %913 = vmatpush3.bf16.xpose.msk.msra.mxu0 %vm1186_vm1, %v908_v25  ;;  %v617_v25 = vshrl.u32 %v616_v24, 7 }
  0x41   : > { %916 = vmatprep.subr.msk.bf16.mxu0 %vm1186_vm1, %v914_v28 }
  0x42   : > { %v618_v26 = vsub.s32 0, %v617_v25 }
  0x48   : > { %919 = vmatpush3.bf16.xpose.msk.msra.mxu0 %vm1186_vm1, %v914_v28 }
  0x49   : > { %922 = vmatprep.subr.msk.bf16.mxu0 %vm1186_vm1, %v920_v31 }
  0x50   : > { %925 = vmatpush3.bf16.xpose.msk.msra.mxu0 %vm1186_vm1, %v920_v31 }
  0x51   : > { %928 = vmatprep.subr.msk.bf16.mxu0 %vm1186_vm1, %v926_v34 }
  0x58   : > { %931 = vmatpush3.bf16.xpose.msk.msra.mxu0 %vm1186_vm1, %v926_v34 }
  0x5f   : > { %861 = vmatmul.mubr.msk.f32.vlgmr.msra.gmra.mrb[0].mxu0 %vm344_vm0, %v301_v35 }
  0x60   : > { %863 = vmatprep.mubr.msk.f32.mxu0 %vm344_vm0, %v302_v36 }
  0x63   : > { %864 = vmatmul.mubr.msk.f32.gmra.mrb[2].mxu0 %vm344_vm0, %v303_v37 }
  0x91   : > { %v327_v39 = vpop.permute.xlu0 %326 }
  0x92   : > { %v337_v40 = vpop.permute.xlu1 %336 }
  0x95   : > { %v332_v41 = vpop.permute.xlu0 %331 }
  0x96   : > { %v342_v47 = vpop.permute.xlu1 %341 }
  0x99   : > { %v513_v10 = vpop.permute.xlu0 %512 }
  0x9a   : > { %v518_v8 = vpop.permute.xlu1 %517 }
  0x9d   : > { %v614_v27 = vpop.permute.xlu0 %613 }
  0x9e   : > { %v619_v28 = vrot.slane %v614_v27, %v618_v26 }
 0x132   : > { %v862_v42 = vpop.f32.mrb[0].mxu0 }
 0x133   : > { %v477_v43 = vadd.f32 %v862_v42, %v332_v41  ;;  %v471_v44 = vpop.f32.mrb[1].mxu0 }
 0x134   : > { %v472_v45 = vadd.f32 %v471_v44, %v327_v39 }
 0x135   : > { %v491_v46 = vmul.f32 0.5, %v477_v43 }
 0x136   : > { %v490_v48 = vmul.f32 0.5, %v472_v45  ;;  %v865_v49 = vpop.f32.mrb[2].mxu0 }
 0x137   : > { %988 = vtanh.f32 %v491_v46  ;;  %v487_v50 = vadd.f32 %v865_v49, %v342_v47  ;;  %v481_v51 = vpop.f32.mrb[3].mxu0 }
 0x138   : > { %990 = vtanh.f32 %v490_v48  ;;  %v482_v52 = vadd.f32 %v481_v51, %v337_v40 }
 0x139   : > { %v493_v53 = vmul.f32 0.5, %v487_v50 }
 0x13a   : > { %v492_v54 = vmul.f32 0.5, %v482_v52 }
 0x13b   : > { %992 = vtanh.f32 %v493_v53 }
 0x13c   : > { %994 = vtanh.f32 %v492_v54 }
 0x141   : > { %v989_v55 = vpop.eup %988 }
 0x142   : > { %v991_v56 = vpop.eup %990  ;;  %v499_v57 = vadd.f32 1.0, %v989_v55 }
 0x143   : > { %v498_v58 = vadd.f32 1.0, %v991_v56 }
 0x144   : > { %v503_v59 = vmul.f32 0.5, %v499_v57 }
 0x145   : > { %v993_v60 = vpop.eup %992  ;;  %v502_v61 = vmul.f32 0.5, %v498_v58 }
 0x146   : > { %v995_v62 = vpop.eup %994  ;;  %v501_v63 = vadd.f32 1.0, %v993_v60 }
 0x147   : > { %v500_v0 = vadd.f32 1.0, %v995_v62  ;;  %v932_v1 = vpack.c.bf16 %v503_v59, %v502_v61 }
 0x148   : > { %v505_v2 = vmul.f32 0.5, %v501_v63 }
 0x149   : > { %v504_v3 = vmul.f32 0.5, %v500_v0  ;;  %933 = vmatprep.subr.bf16.mxu1 %v932_v1 }
 0x14a   : > { %935 = vmatpush3.bf16.msra.mxu1 %v932_v1 }
 0x14b   : > { %v936_v4 = vpack.c.bf16 %v505_v2, %v504_v3 }
 0x14d   : > { %937 = vmatprep.subr.bf16.mxu1 %v936_v4 }
 0x14e   : > { %939 = vmatpush3.bf16.msra.mxu1 %v936_v4 }
 0x14f   : > { %940 = vmatprep.subr.bf16.mxu1 %v1067_v6 }
 0x151   : > { %875 = vmatmul.mubr.msk.f32.vlgmr.msra.gmra.mrb[0].mxu1 %vm344_vm0, %v507_v5 }
 0x152   : > { %881 = vmatprep.mubr.msk.f32.mxu1 %vm1068_vm2, %v1069_v7 }
 0x224   : > { %v876_v9 = vpop.f32.mrb[0].mxu1 }
 0x225   : > { %v598_v11 = vadd.f32 %v876_v9, %v518_v8  ;;  %v592_v12 = vpop.f32.mrb[1].mxu1 }
 0x226   : > { %v593_v13 = vadd.f32 %v592_v12, %v513_v10 }
 0x227   : > { %v602_v14 = vmul.f32 0.5, %v598_v11 }
 0x228   : > { %v601_v15 = vmul.f32 0.5, %v593_v13 }
 0x229   : > { %996 = vtanh.f32 %v602_v14 }
 0x22a   : > { %998 = vtanh.f32 %v601_v15 }
 0x233   : > { %v997_v16 = vpop.eup %996 }
 0x234   : > { %v999_v17 = vpop.eup %998  ;;  %v606_v18 = vadd.f32 1.0, %v997_v16 }
 0x235   : > { %v605_v19 = vadd.f32 1.0, %v999_v17 }
 0x236   : > { %v608_v20 = vmul.f32 0.5, %v606_v18 }
 0x237   : > { %v607_v21 = vmul.f32 0.5, %v605_v19 }
 0x239   : > { %v941_v22 = vpack.c.bf16 %v608_v20, %v607_v21 }
 0x23b   : > { %942 = vmatpush3.bf16.msra.mxu1 %v941_v22 }
 0x23e   : > { %882 = vmatmul.mubr.msk.f32.vlgmr.msra.gmra.mrb[2].mxu1 %vm620_vm3, %v609_v23 }
 0x311   : > { %v690_v29 = vpop.f32.mrb[2].mxu1 }
 0x312   : > { %v691_v30 = vadd.f32 %v690_v29, %v619_v28  ;;  %v883_v31 = vpop.f32.mrb[3].mxu1 }
 0x314   : > { %v694_v32 = vand.u32 2147483647, %v691_v30 }
 0x316   : > { %v695_v33 = vadd.f32 1.0, %v694_v32 }
 0x318   : > { %1000 = vrcp.f32 %v695_v33 }
 0x322   : > { %v1001_v34 = vpop.eup %1000 }
 0x323   : > { %v697_v35 = vmul.f32 %v1001_v34, %v691_v30 }
 0x325   : > { %698 = vst [vmem:[%s285_s17] sm:$0x1] %v697_v35 }
 0x326   : > { %1015 = shalt.err (!%p1012_p3)
}
 0x327   : > { %s1016_s14 = scalar_lea.hbm %s1272_s21, 16  ;;  %s1020_s10 = scalar_lea.hbm %s1321_s7, 48 }
 0x328   : > { %p1017_p4 = scmp.ne.s32.totalorder %s1272_s21, %s1016_s14  ;;  %p1021_p9 = scmp.lt.u32.totalorder %s1272_s21, %s1321_s7 }
 0x329   : > { %p1022_p10 = scmp.lt.u32.totalorder %s1020_s10, %s1016_s14  ;;  %p1024_p12 = scmp.lt.u32.totalorder %s1016_s14, %s1272_s21 }
 0x32a   : > { %p1018_p7 = pnand %p1017_p4, %p1149_p5 }
 0x32b   : > { %p1023_p11 = por %p1022_p10, %p1021_p9 }
 0x32c   : > { %p1019_p8 = pneg %p1018_p7 }
 0x32d   : > { %p1025_p13 = por %p1024_p12, %p1023_p11 }
 0x32f   : > { %p1026_p0 = pnand %p1025_p13, %p1019_p8 }
 0x331   : > { %1029 = shalt.err (!%p1026_p0)
}
 0x332   : > { %943 = dma.vmem_to_hbm [thread:$0]  (%p1149_p5), %s1274_s18, 16, %s1272_s21, %s700_s22  }
 0x333 PF: > { %p949_p1 = scmp.ge.s32.totalorder %s1064_s29, 2  ;;  %s724_s17 = sand.u32 1, %s1052_s26  }
 0x334   : > { %s725_s19 = scalar_lea.sflag [#allocation4], %s724_s17 }
 0x335   : > { %p946_p2 = pnand %p949_p1, %p1153_p6 }
 0x337   : > { %1047 = dma.done.wait (!%p946_p2), %s725_s19, 16  }
 0x338   : > { %1049 = vsyncadd (!%p946_p2), %s725_s19, 4294967280  ;;  %p19_p3 = scmp.ge.s32.totalorder %s1137_s8, 5   ;;  %s1326_s26 = smov %s1056_s27 }
 0x339   : > { %s1327_s27 = smov %s1060_s28  ;;  %s1328_s28 = smov %s1147_s11 }
 0x33a   : > { %s1329_s29 = smov %s1137_s8  ;;  %21 = sbr.rel (!%p19_p3) target bundleno = 6 (0x6), region = 83 }
 0x341   :  { %729 = vsyncpa [#allocation4], 1 }
 0x342   :  { %731 = vsyncpa [#allocation4 + $0x1], 1 }

</bundles_post_ra>
